<compile_context>
chip_gen: v6e
topology: v6e:2x2x1
jax: 0.10.0
libtpu: 0.0.40
codegen_flags: <defaults>
</compile_context>

<pallas_src>
import functools

import numpy as np
import jax
import jax.numpy as jnp
from jax.experimental import pallas as pl
from jax.experimental.pallas import tpu as pltpu


def _round_up(x, m):
    return (x + m - 1) // m * m


def _translate(img, dx, dy):
    """torchvision-style integer affine translate with fill=0.
    positive dx shifts the image right, positive dy shifts it down."""
    # TODO(synk): general (sub-pixel / rotated) affine has no clean Pallas
    # equivalent; the module only ever uses integer translations, done here
    # as pad+slice in JAX glue.
    B, C, H, W = img.shape
    pady, padx = abs(dy), abs(dx)
    padded = jnp.pad(img, ((0, 0), (0, 0), (pady, pady), (padx, padx)))
    y0 = pady - dy
    x0 = padx - dx
    return padded[:, :, y0:y0 + H, x0:x0 + W]


def _spt_kernel(x_ref, w_ref, pc_ref, add_ref, mask_ref, o_ref, *, embed_dim):
    # x_ref   : (TM, Kp)  bf16 im2col rows (zero rows at cls / pad positions)
    # w_ref   : (Kp, Ep)  bf16 projection weight (zero-padded), resident
    # pc_ref  : (8,  Ep)  f32  packed params: row0=conv bias, row1=LN gamma, row2=LN beta
    # add_ref : (TM, Ep)  f32  per-row additive term (pos enc; cls+pos[0] at cls rows; 0 at pad rows)
    # mask_ref: (TM, 1)   f32  1.0 for patch rows, 0.0 for cls / padded rows
    # o_ref   : (TM, Ep)  f32
    pc = pc_ref[...]
    bias = pc[0:1, :]
    gamma = pc[1:2, :]
    beta = pc[2:3, :]

    # Patch projection: conv-as-matmul on the MXU, f32 accumulation.
    y = jnp.dot(x_ref[...], w_ref[...], preferred_element_type=jnp.float32) + bias

    # One-pass LayerNorm stats over the real embed_dim columns.  Padded columns
    # of y are exactly zero (zero-padded weight columns + zero-padded bias), so
    # summing over the full padded lane width is exact; divide by the real E.
    inv_e = jnp.float32(1.0 / embed_dim)
    s = jnp.sum(y, axis=-1, keepdims=True)
    sq = jnp.sum(y * y, axis=-1, keepdims=True)
    mean = s * inv_e
    var = sq * inv_e - mean * mean
    # gamma/beta are zero in the padded columns, so padded output columns stay 0.
    yn = (y - mean) * jax.lax.rsqrt(var + jnp.float32(1e-5)) * gamma + beta

    # mask==0 rows (cls / padding) take only the additive term (cls + pos[0] or 0).
    o_ref[...] = yn * mask_ref[...] + add_ref[...]


def shifted_patch_tokenization(image, params, patch_size, *, row_tile=512):
    pw, ph = patch_size
    B, C, H, W = image.shape
    # Mirrors the module: Conv2d kernel_size = (patch_width, patch_height).
    kH, kW = pw, ph
    nH, nW = H // kH, W // kW
    P = nH * nW
    E = params["w"].shape[0]
    dx, dy = pw // 2, ph // 2

    # ---- glue: 4 shifted copies + original, channel concat (pure data movement).
    shifts = [image,
              _translate(image, -dx, -dy),    # shift_left_up
              _translate(image,  dx, -dy),    # shift_right_up
              _translate(image, -dx,  dy),    # shift_left_down
              _translate(image,  dx,  dy)]    # shift_right_down
    cat = jnp.concatenate(shifts, axis=1).astype(jnp.bfloat16)   # bf16 early: halves im2col traffic
    TC = 5 * C
    K = TC * kH * kW

    # ---- glue: im2col (B, P, K), flattened in (channel, kh, kw) order to match
    # the PyTorch conv weight (O, I, kH, kW) layout.
    xp = cat.reshape(B, TC, nH, kH, nW, kW)
    xp = xp.transpose(0, 2, 4, 1, 3, 5).reshape(B, P, K)

    # ---- padded sizes: lane-dense K/E (multiples of 128), flattened row axis.
    Kp = _round_up(K, 128)
    Ep = _round_up(E, 128)
    S = 1 + P
    rows = B * S
    TM = row_tile if rows >= row_tile else _round_up(rows, 16)
    rows_pad = _round_up(rows, TM)

    # x rows: one zero row per batch (cls slot) + P patch rows; pad K and rows.
    x_rows = jnp.pad(xp, ((0, 0), (1, 0), (0, Kp - K))).reshape(rows, Kp)
    x_rows = jnp.pad(x_rows, ((0, rows_pad - rows), (0, 0)))

    # Projection weight (K, E) -> (Kp, Ep), bf16 operand for the MXU.
    w2d = jnp.pad(params["w"].reshape(E, K).T,
                  ((0, Kp - K), (0, Ep - E))).astype(jnp.bfloat16)

    # Packed small params: one (8, Ep) tile, one resident DMA.
    pc = jnp.zeros((8, Ep), jnp.float32)
    pc = pc.at[0, :E].set(params["b"])
    pc = pc.at[1, :E].set(params["ln_w"])
    pc = pc.at[2, :E].set(params["ln_b"])

    # Per-row additive term: pos enc for patch rows, cls + pos[0] for cls rows,
    # zeros for padded rows.
    pos = params["pos"][0]                                   # (1+P, E)
    add_seq = pos.at[0].add(params["cls"][0, 0])             # cls token folded into row 0
    add = jnp.broadcast_to(add_seq[None], (B, S, E)).reshape(rows, E)
    add = jnp.pad(add, ((0, rows_pad - rows), (0, Ep - E)))

    # Per-row mask: 0 at cls rows (output is cls+pos only), 1 at patch rows, 0 at pad rows.
    mask_seq = jnp.concatenate([jnp.zeros((1,), jnp.float32),
                                jnp.ones((P,), jnp.float32)])
    mask = jnp.broadcast_to(mask_seq[None], (B, S)).reshape(rows)
    mask = jnp.pad(mask, (0, rows_pad - rows)).reshape(rows_pad, 1)

    kernel = functools.partial(_spt_kernel, embed_dim=E)

    out = pl.pallas_call(
        kernel,
        out_shape=jax.ShapeDtypeStruct((rows_pad, Ep), jnp.float32),
        grid_spec=pltpu.PrefetchScalarGridSpec(
            num_scalar_prefetch=0,
            grid=(rows_pad // TM,),
            in_specs=[
                pl.BlockSpec((TM, Kp), lambda i: (i, 0)),    # x rows (bf16)
                pl.BlockSpec((Kp, Ep), lambda i: (0, 0)),    # weight (resident across steps)
                pl.BlockSpec((8, Ep), lambda i: (0, 0)),     # packed bias/gamma/beta
                pl.BlockSpec((TM, Ep), lambda i: (i, 0)),    # per-row additive (pos / cls)
                pl.BlockSpec((TM, 1), lambda i: (i, 0)),     # per-row mask
            ],
            out_specs=pl.BlockSpec((TM, Ep), lambda i: (i, 0)),
        ),
        compiler_params=pltpu.CompilerParams(
            dimension_semantics=("parallel",)),
    )(x_rows, w2d, pc, add, mask)

    # Drop row / lane padding, reshape to (B, 1+P, E).
    return out[:rows, :E].reshape(B, S, E)


def reference(image, params, patch_size):
    """Pure-JAX f32 reference mirroring the PyTorch forward."""
    pw, ph = patch_size
    dx, dy = pw // 2, ph // 2
    shifts = [image,
              _translate(image, -dx, -dy), _translate(image, dx, -dy),
              _translate(image, -dx, dy), _translate(image, dx, dy)]
    cat = jnp.concatenate(shifts, axis=1)
    y = jax.lax.conv_general_dilated(
        cat, params["w"], window_strides=(pw, ph), padding="VALID",
        dimension_numbers=("NCHW", "OIHW", "NCHW"))
    y = y + params["b"][None, :, None, None]
    B, E, nH, nW = y.shape
    y = y.reshape(B, E, nH * nW).transpose(0, 2, 1)
    mean = y.mean(-1, keepdims=True)
    var = ((y - mean) ** 2).mean(-1, keepdims=True)
    yn = (y - mean) / jnp.sqrt(var + 1e-5) * params["ln_w"] + params["ln_b"]
    cls = jnp.broadcast_to(params["cls"], (B, 1, E))
    return jnp.concatenate([cls, yn], axis=1) + params["pos"]


if __name__ == "__main__":
    # Small shapes consistent with the module:
    # image 16x16, 3 channels, patch 4x4 -> 16 patches, embed_dim 32.
    B, C, H, W = 2, 3, 16, 16
    pw = ph = 4
    E = 32
    TC = 5 * C
    P = (H // pw) * (W // ph)

    key = jax.random.PRNGKey(0)
    k1, k2, k3, k4, k5, k6, kx = jax.random.split(key, 7)
    # Deterministic synthetic parameters (module inits cls/pos to zeros; we use
    # small random values so the elementwise adds are exercised non-trivially).
    params = {
        "w":    jax.random.normal(k1, (E, TC, pw, ph), jnp.float32) * 0.02,   # Conv2d weight (O,I,kH,kW)
        "b":    jax.random.normal(k2, (E,), jnp.float32) * 0.02,              # Conv2d bias
        "ln_w": 1.0 + 0.1 * jax.random.normal(k3, (E,), jnp.float32),         # LayerNorm weight
        "ln_b": 0.1 * jax.random.normal(k4, (E,), jnp.float32),               # LayerNorm bias
        "cls":  jax.random.normal(k5, (1, 1, E), jnp.float32) * 0.02,         # cls token
        "pos":  jax.random.normal(k6, (1, 1 + P, E), jnp.float32) * 0.02,     # positional encoding
    }
    x = jax.random.normal(kx, (B, C, H, W), jnp.float32)

    out = shifted_patch_tokenization(x, params, (pw, ph))
    out = jax.block_until_ready(out)

    ref = reference(x, params, (pw, ph))
    assert out.shape == (B, 1 + P, E), out.shape
    # Tolerance reflects bf16 matmul operands (f32 accumulation) vs the f32 reference.
    np.testing.assert_allclose(np.asarray(out), np.asarray(ref), rtol=5e-2, atol=5e-2)
    print("KERNEL_OK")
</pallas_src>

<mosaic_0001>
module attributes {stable_mosaic.version = 11 : i64} {
  func.func @_spt_kernel(%arg0: i32, %arg1: memref<48x256xbf16, #tpu.memory_space<vmem>>, %arg2: memref<256x128xbf16, #tpu.memory_space<vmem>>, %arg3: memref<8x128xf32, #tpu.memory_space<vmem>>, %arg4: memref<48x128xf32, #tpu.memory_space<vmem>>, %arg5: memref<48x1xf32, #tpu.memory_space<vmem>>, %arg6: memref<48x128xf32, #tpu.memory_space<vmem>>) attributes {dimension_semantics = [#tpu.dimension_semantics<parallel>], iteration_bounds = array<i64: 1>, scalar_prefetch = 0 : i64, scratch_operands = 0 : i64, tpu.core_type = #tpu.core_type<tc>, window_params = [{transform_indices = @transform_0, window_bounds = array<i64: 48, 256>}, {pipeline_mode = #tpu.pipeline_mode<synchronous>, transform_indices = @transform_1, window_bounds = array<i64: 256, 128>}, {pipeline_mode = #tpu.pipeline_mode<synchronous>, transform_indices = @transform_2, window_bounds = array<i64: 8, 128>}, {transform_indices = @transform_3, window_bounds = array<i64: 48, 128>}, {transform_indices = @transform_4, window_bounds = array<i64: 48, 1>}, {transform_indices = @transform_5, window_bounds = array<i64: 48, 128>}]} {
    %c0 = arith.constant 0 : index
    %c0_0 = arith.constant 0 : index
    %0 = vector.load %arg3[%c0, %c0_0] : memref<8x128xf32, #tpu.memory_space<vmem>>, vector<8x128xf32>
    %1 = vector.extract_strided_slice %0 {offsets = [0, 0], sizes = [1, 128], strides = [1, 1]} : vector<8x128xf32> to vector<1x128xf32>
    %2 = vector.extract_strided_slice %0 {offsets = [1, 0], sizes = [1, 128], strides = [1, 1]} : vector<8x128xf32> to vector<1x128xf32>
    %3 = vector.extract_strided_slice %0 {offsets = [2, 0], sizes = [1, 128], strides = [1, 1]} : vector<8x128xf32> to vector<1x128xf32>
    %c0_1 = arith.constant 0 : index
    %c0_2 = arith.constant 0 : index
    %4 = vector.load %arg1[%c0_1, %c0_2] : memref<48x256xbf16, #tpu.memory_space<vmem>>, vector<48x256xbf16>
    %c0_3 = arith.constant 0 : index
    %c0_4 = arith.constant 0 : index
    %5 = vector.load %arg2[%c0_3, %c0_4] : memref<256x128xbf16, #tpu.memory_space<vmem>>, vector<256x128xbf16>
    %cst = arith.constant dense<0.000000e+00> : vector<48x128xf32>
    %6 = tpu.matmul %4, %5, %cst {dimension_numbers = #tpu.dot_dimension_numbers<[1], [0], [0], [1], [0, 0, 1, 1], [], []>} : vector<48x256xbf16>, vector<256x128xbf16>, vector<48x128xf32> -> vector<48x128xf32>
    %7 = vector.broadcast %1 : vector<1x128xf32> to vector<48x128xf32>
    %8 = arith.addf %6, %7 : vector<48x128xf32>
    %cst_5 = arith.constant dense<0.000000e+00> : vector<48xf32>
    %9 = vector.multi_reduction <add>, %8, %cst_5 [1] : vector<48x128xf32> to vector<48xf32>
    %10 = vector.shape_cast %9 : vector<48xf32> to vector<48x1xf32>
    %11 = arith.mulf %8, %8 : vector<48x128xf32>
    %cst_6 = arith.constant dense<0.000000e+00> : vector<48xf32>
    %12 = vector.multi_reduction <add>, %11, %cst_6 [1] : vector<48x128xf32> to vector<48xf32>
    %13 = vector.shape_cast %12 : vector<48xf32> to vector<48x1xf32>
    %cst_7 = arith.constant 3.125000e-02 : f32
    %14 = vector.broadcast %cst_7 : f32 to vector<48x1xf32>
    %15 = arith.mulf %10, %14 : vector<48x1xf32>
    %cst_8 = arith.constant 3.125000e-02 : f32
    %16 = vector.broadcast %cst_8 : f32 to vector<48x1xf32>
    %17 = arith.mulf %13, %16 : vector<48x1xf32>
    %18 = arith.mulf %15, %15 : vector<48x1xf32>
    %19 = arith.subf %17, %18 : vector<48x1xf32>
    %20 = vector.broadcast %15 : vector<48x1xf32> to vector<48x128xf32>
    %21 = arith.subf %8, %20 : vector<48x128xf32>
    %cst_9 = arith.constant 9.99999974E-6 : f32
    %22 = vector.broadcast %cst_9 : f32 to vector<48x1xf32>
    %23 = arith.addf %19, %22 : vector<48x1xf32>
    %24 = math.rsqrt %23 : vector<48x1xf32>
    %25 = vector.broadcast %24 : vector<48x1xf32> to vector<48x128xf32>
    %26 = arith.mulf %21, %25 : vector<48x128xf32>
    %27 = vector.broadcast %2 : vector<1x128xf32> to vector<48x128xf32>
    %28 = arith.mulf %26, %27 : vector<48x128xf32>
    %29 = vector.broadcast %3 : vector<1x128xf32> to vector<48x128xf32>
    %30 = arith.addf %28, %29 : vector<48x128xf32>
    %c0_10 = arith.constant 0 : index
    %c0_11 = arith.constant 0 : index
    %31 = vector.load %arg5[%c0_10, %c0_11] : memref<48x1xf32, #tpu.memory_space<vmem>>, vector<48x1xf32>
    %32 = vector.broadcast %31 : vector<48x1xf32> to vector<48x128xf32>
    %33 = arith.mulf %30, %32 : vector<48x128xf32>
    %c0_12 = arith.constant 0 : index
    %c0_13 = arith.constant 0 : index
    %34 = vector.load %arg4[%c0_12, %c0_13] : memref<48x128xf32, #tpu.memory_space<vmem>>, vector<48x128xf32>
    %35 = arith.addf %33, %34 : vector<48x128xf32>
    %c0_14 = arith.constant 0 : index
    %c0_15 = arith.constant 0 : index
    %36 = vector.load %arg6[%c0_14, %c0_15] : memref<48x128xf32, #tpu.memory_space<vmem>>, vector<48x128xf32>
    tpu.vector_store %arg6[%c0_14, %c0_15], %35 {strides = array<i32>} : memref<48x128xf32, #tpu.memory_space<vmem>>, vector<48x128xf32>,
    return
  }
  func.func @transform_0(%arg0: i32) -> (i32, i32) {
    %c0_i32 = arith.constant 0 : i32
    %c0_i32_0 = arith.constant 0 : i32
    return %arg0, %c0_i32 : i32, i32
  }
  func.func @transform_1(%arg0: i32) -> (i32, i32) {
    %c0_i32 = arith.constant 0 : i32
    %c0_i32_0 = arith.constant 0 : i32
    %c0_i32_1 = arith.constant 0 : i32
    return %c0_i32, %c0_i32_0 : i32, i32
  }
  func.func @transform_2(%arg0: i32) -> (i32, i32) {
    %c0_i32 = arith.constant 0 : i32
    %c0_i32_0 = arith.constant 0 : i32
    %c0_i32_1 = arith.constant 0 : i32
    return %c0_i32, %c0_i32_0 : i32, i32
  }
  func.func @transform_3(%arg0: i32) -> (i32, i32) {
    %c0_i32 = arith.constant 0 : i32
    %c0_i32_0 = arith.constant 0 : i32
    return %arg0, %c0_i32 : i32, i32
  }
  func.func @transform_4(%arg0: i32) -> (i32, i32) {
    %c0_i32 = arith.constant 0 : i32
    %c0_i32_0 = arith.constant 0 : i32
    return %arg0, %c0_i32 : i32, i32
  }
  func.func @transform_5(%arg0: i32) -> (i32, i32) {
    %c0_i32 = arith.constant 0 : i32
    %c0_i32_0 = arith.constant 0 : i32
    return %arg0, %c0_i32 : i32, i32
  }
}

</mosaic_0001>

<bundles_post_ra>
// kernel: tpu_custom_call.1
= control target key start
LH: loop header
LB: loop body
LE: loop exit
PB: predicated region body
PF: predicated region fallthrough
CT: control target
= control target key end

     0   :  { %10 = vsyncpa [#allocation3], 0  ;;  %s824_s0 = inlined_call_operand.vmem [shape: bf16[48,256], index: 0, kind: input, shape index: {}]   ;;  %s825_s1 = inlined_call_operand.hbm [shape: bf16[256,128], index: 1, kind: input, shape index: {}]   ;;  %s826_s2 = inlined_call_operand.hbm [shape: f32[8,128], index: 2, kind: input, shape index: {}]   ;;  %s827_s3 = inlined_call_operand.hbm [shape: f32[48,128], index: 3, kind: input, shape index: {}]   ;;  %s828_s4 = inlined_call_operand.vmem [shape: f32[48,1], index: 4, kind: input, shape index: {}]   ;;  %s829_s5 = inlined_call_operand.hbm [shape: f32[48,128], index: 5, kind: output, shape index: {}]  }
   0x1   :  { %11 = vsyncpa [#allocation6], 0 }
   0x2   :  { %12 = vsyncpa [#allocation4], 0  ;;  %s669_s18 = smov [#allocation5]   ;;  %s670_s20 = smov [#allocation2]  }
   0x3   :  { %s33_s19 = sshll.u32 %s669_s18, 4  ;;  %s20_s21 = sshll.u32 %s670_s20, 4  ;;  %s34_s19 = int_to_ptr.vmem [resolvable:$true] %s33_s19  ;;  %s21_s21 = int_to_ptr.vmem [resolvable:$true] %s20_s21 }
   0x4   :  { %s591_s22 = scalar_lea.vmem %s34_s19, 128  ;;  %p596_p1 = scmp.lt.s32.totalorder %s34_s19, %s34_s19 }
   0x5   :  { %p592_p0 = scmp.ne.s32.totalorder %s34_s19, %s591_s22  ;;  %p597_p2 = scmp.lt.s32.totalorder %s591_s22, %s591_s22 }
   0x7   :  { %p598_p3 = por %p597_p2, %p596_p1 }
   0x9   :  { %p599_p4 = pnand %p598_p3, %p592_p0 }
   0xb   :  { %602 = shalt.err (!%p599_p4)
}
   0xc   :  { %36 = dma.hbm_to_vmem [thread:$0]  %s826_s2, 128, %s34_s19, [#allocation6]  }
   0xd   :  { %s611_s25 = scalar_lea.vmem %s21_s21, 2048  ;;  %p616_p6 = scmp.lt.s32.totalorder %s21_s21, %s21_s21 }
   0xe   :  { %p612_p5 = scmp.ne.s32.totalorder %s21_s21, %s611_s25  ;;  %p617_p7 = scmp.lt.s32.totalorder %s611_s25, %s611_s25 }
  0x10   :  { %p618_p8 = por %p617_p7, %p616_p6 }
  0x12   :  { %p619_p9 = pnand %p618_p8, %p612_p5 }
  0x14   :  { %622 = shalt.err (!%p619_p9)
}
  0x15   :  { %s671_s26 = smov 64   ;;  %s672_s27 = smov 4  }
  0x16   :  { %26 = dma.hbm_to_vmem [thread:$0]  %s825_s1, 2048, %s21_s21, [#allocation3], %s671_s26, %s671_s26, %s672_s27  }
  0x17   :  { %s673_s30 = smov [#allocation7]  }
  0x18   :  { %s42_s6 = sshll.u32 %s673_s30, 4  ;;  %s43_s6 = int_to_ptr.vmem [resolvable:$true] %s42_s6 }
  0x19   :  { %s631_s7 = scalar_lea.vmem %s43_s6, 768  ;;  %p636_p11 = scmp.lt.s32.totalorder %s43_s6, %s43_s6 }
  0x1a   :  { %p632_p10 = scmp.ne.s32.totalorder %s43_s6, %s631_s7  ;;  %p637_p12 = scmp.lt.s32.totalorder %s631_s7, %s631_s7 }
  0x1c   :  { %p638_p13 = por %p637_p12, %p636_p11 }
  0x1e   :  { %p639_p0 = pnand %p638_p13, %p632_p10 }
  0x20   :  { %642 = shalt.err (!%p639_p0)
}
  0x21   :  { %s674_s2 = smov 128   ;;  %s675_s8 = smov 8  }
  0x22   :  { %48 = dma.hbm_to_vmem [thread:$0]  %s827_s3, 768, %s43_s6, [#allocation6], %s674_s2, %s674_s2, %s675_s8  }
  0x23   :  { %663 = dma.done.wait [#allocation3], 2048  }
  0x24   :  { %664 = vsyncadd [#allocation3], 4294965248 }
  0x25   :  { %665 = dma.done.wait [#allocation6], 896  }
  0x26   :  { %666 = vsyncadd [#allocation6], 4294966400  ;;  %v546_v0 = vld [vmem:[#allocation2 + $0x78] sm:$0xff]   ;;  %v548_v2 = vld [vmem:[#allocation2 + $0x70] sm:$0xff]   ;;  %v676_v22 = vmov 0   ;;  %v100_v23 = vlaneseq }
  0x27   :  { %v547_v1 = vld [vmem:[#allocation2 + $0x38] sm:$0xff]   ;;  %485 = vmatprep.subr.bf16.mxu0 %v546_v0  ;;  %519 = vmatprep.subr.bf16.mxu1 %v546_v0  ;;  %v549_v3 = vld [vmem:[#allocation2 + $0x30] sm:$0xff]   ;;  %v550_v4 = vld [vmem:[#allocation2 + $0x68] sm:$0xff]  }
  0x28   :  { %486 = vmatpush3.bf16.msra.mxu0 %v547_v1  ;;  %527 = vmatpush3.bf16.msra.mxu1 %v547_v1  ;;  %v551_v5 = vld [vmem:[#allocation2 + $0x28] sm:$0xff]   ;;  %v552_v6 = vld [vmem:[#allocation2 + $0x60] sm:$0xff]   ;;  %v554_v8 = vld [vmem:[#allocation2 + $0x58] sm:$0xff]   ;;  %v738_v24 = vshrl.u32 %v100_v23, 7 }
  0x29   :  { %487 = vmatprep.subr.bf16.mxu0 %v548_v2  ;;  %520 = vmatprep.subr.bf16.mxu1 %v548_v2  ;;  %v553_v7 = vld [vmem:[#allocation2 + $0x20] sm:$0xff]   ;;  %v555_v9 = vld [vmem:[#allocation2 + $0x18] sm:$0xff]   ;;  %v556_v10 = vld [vmem:[#allocation2 + $0x50] sm:$0xff]  }
  0x2a   :  { %v564_v11 = vld [vmem:[%s824_s0 + $0x4] ss:$8 sps:$4 sm:$0xff]   ;;  %v567_v12 = vld [vmem:[%s824_s0 + $0x14] ss:$8 sps:$4 sm:$0xff]   ;;  %v562_v18 = vld [vmem:[%s824_s0] ss:$8 sps:$4 sm:$0xff]   ;;  %545 = vset.pattern.permute.xlu1 %v676_v22  ;;  %544 = vset.pattern.permute.xlu0 %v676_v22 }
  0x2b   :  { %v557_v13 = vld [vmem:[#allocation2 + $0x10] sm:$0xff]   ;;  %v558_v14 = vld [vmem:[#allocation2 + $0x48] sm:$0xff]   ;;  %262 = vmatprep.mubr.bf16.mxu0 %v564_v11  ;;  %270 = vmatprep.mubr.bf16.mxu1 %v567_v12  ;;  %v560_v16 = vld [vmem:[#allocation2 + $0x40] sm:$0xff]   ;;  %v102_v25 = vsub.s32 0, %v738_v24 }
  0x2c   :  { %488 = vmatpush3.bf16.msra.mxu0 %v549_v3  ;;  %528 = vmatpush3.bf16.msra.mxu1 %v549_v3  ;;  %v559_v15 = vld [vmem:[#allocation2 + $0x8] sm:$0xff]   ;;  %v561_v17 = vld [vmem:[#allocation2] sm:$0xff]   ;;  %v565_v19 = vld [vmem:[%s824_s0 + $0x10] ss:$8 sps:$4 sm:$0xff]  }
  0x2d   :  { %489 = vmatprep.subr.bf16.mxu0 %v550_v4  ;;  %521 = vmatprep.subr.bf16.mxu1 %v550_v4  ;;  %v568_v20 = vld [vmem:[%s824_s0 + $0x24] ss:$8 sps:$4 sm:$0xff]   ;;  %v570_v21 = vld [vmem:[%s824_s0 + $0x20] ss:$8 sps:$4 sm:$0xff]   ;;  %v387_v54 = vld [vmem:[%s828_s4 + $0x10] sm:$0xff] }
  0x2e   :  { %v741_v26 = vld [vmem:[#allocation5] sm:$0xff]  ;;  %v386_v53 = vld [vmem:[%s828_s4 + $0x8] sm:$0xff]  ;;  %v388_v55 = vld [vmem:[%s828_s4 + $0x18] sm:$0xff] }
  0x2f   :  { %v103_v29 = vrot.slane %v741_v26, %v102_v25  ;;  %v389_v56 = vld [vmem:[%s828_s4 + $0x20] sm:$0xff]  ;;  %v390_v63 = vld [vmem:[%s828_s4 + $0x28] sm:$0xff] }
  0x30   :  { %490 = vmatpush3.bf16.msra.mxu0 %v551_v5  ;;  %529 = vmatpush3.bf16.msra.mxu1 %v551_v5  ;;  %v385_v57 = vld [vmem:[%s828_s4] sm:$0xff]  ;;  %s677_s4 = smov [#allocation8]  }
  0x31   :  { %491 = vmatprep.subr.bf16.mxu0 %v552_v6  ;;  %522 = vmatprep.subr.bf16.mxu1 %v552_v6  ;;  %s450_s7 = sshll.u32 %s677_s4, 4  ;;  %s451_s7 = int_to_ptr.vmem [resolvable:$true] %s450_s7 }
  0x32   :  { %s643_s9 = scalar_lea.vmem %s451_s7, 768  ;;  %p648_p2 = scmp.lt.s32.totalorder %s451_s7, %s451_s7 }
  0x33   :  { %p644_p1 = scmp.ne.s32.totalorder %s451_s7, %s643_s9  ;;  %p649_p3 = scmp.lt.s32.totalorder %s643_s9, %s643_s9 }
  0x34   :  { %492 = vmatpush3.bf16.msra.mxu0 %v553_v7  ;;  %530 = vmatpush3.bf16.msra.mxu1 %v553_v7 }
  0x35   :  { %493 = vmatprep.subr.bf16.mxu0 %v554_v8  ;;  %523 = vmatprep.subr.bf16.mxu1 %v554_v8  ;;  %p650_p4 = por %p649_p3, %p648_p2 }
  0x37   :  { %p651_p5 = pnand %p650_p4, %p644_p1 }
  0x38   :  { %494 = vmatpush3.bf16.msra.mxu0 %v555_v9  ;;  %531 = vmatpush3.bf16.msra.mxu1 %v555_v9 }
  0x39   :  { %495 = vmatprep.subr.bf16.mxu0 %v556_v10  ;;  %524 = vmatprep.subr.bf16.mxu1 %v556_v10 }
  0x3c   :  { %496 = vmatpush3.bf16.msra.mxu0 %v557_v13  ;;  %532 = vmatpush3.bf16.msra.mxu1 %v557_v13 }
  0x3d   :  { %497 = vmatprep.subr.bf16.mxu0 %v558_v14  ;;  %525 = vmatprep.subr.bf16.mxu1 %v558_v14 }
  0x40   :  { %498 = vmatpush3.bf16.msra.mxu0 %v559_v15  ;;  %533 = vmatpush3.bf16.msra.mxu1 %v559_v15 }
  0x41   :  { %499 = vmatprep.subr.bf16.mxu0 %v560_v16  ;;  %526 = vmatprep.subr.bf16.mxu1 %v560_v16 }
  0x44   :  { %500 = vmatpush3.bf16.msra.mxu0 %v561_v17  ;;  %534 = vmatpush3.bf16.msra.mxu1 %v561_v17 }
  0x47   :  { %263 = vmatmul.mubr.bf16.vlgmr.msra.gmra.mxu0 %v562_v18  ;;  %271 = vmatmul.mubr.bf16.vlgmr.msra.gmra.mxu1 %v565_v19 }
  0x48   :  { %278 = vmatprep.mubr.bf16.mxu1 %v568_v20 }
  0x4f   :  { %279 = vmatmul.mubr.bf16.gmra.mxu1 %v570_v21 }
 0x107   :  { %v501_v27 = vpop.f32.mrf.mxu0  ;;  %v507_v28 = vpop.f32.mrf.mxu1 }
 0x109   :  { %v502_v30 = vpop.f32.mrf.mxu0  ;;  %v508_v31 = vpop.f32.mrf.mxu1 }
 0x10a   :  { %v503_v32 = vadd.f32 %v502_v30, %v501_v27  ;;  %v509_v33 = vadd.f32 %v508_v31, %v507_v28 }
 0x10b   :  { %v504_v34 = vpop.f32.mrf.mxu0  ;;  %v510_v35 = vpop.f32.mrf.mxu1 }
 0x10c   :  { %v744_v36 = vadd.f32 %v503_v32, %v103_v29  ;;  %v746_v37 = vadd.f32 %v509_v33, %v103_v29  ;;  %v367_v32 = vsub.s32 1, %v738_v24 }
 0x10d   :  { %v505_v38 = vpop.f32.mrf.mxu0  ;;  %v511_v39 = vpop.f32.mrf.mxu1 }
 0x10e   :  { %v506_v40 = vadd.f32 %v505_v38, %v504_v34  ;;  %v512_v41 = vadd.f32 %v511_v39, %v510_v35  ;;  %291 = vadd.xlane.f32.xlu1 %v746_v37  ;;  %287 = vadd.xlane.f32.xlu0 %v744_v36  ;;  %v299_v45 = vmul.f32 %v744_v36, %v744_v36  ;;  %v377_v35 = vsub.s32 2, %v738_v24 }
 0x10f   :  { %v513_v42 = vpop.f32.mrf.mxu1  ;;  %v301_v48 = vmul.f32 %v746_v37, %v746_v37 }
 0x110   :  { %v750_v43 = vadd.f32 %v506_v40, %v103_v29  ;;  %v752_v44 = vadd.f32 %v512_v41, %v103_v29  ;;  %v796_v40 = vrot.slane %v741_v26, %v367_v32 }
 0x111   :  { %v514_v46 = vpop.f32.mrf.mxu1 }
 0x112   :  { %293 = vadd.xlane.f32.xlu1 %v752_v44  ;;  %305 = vadd.xlane.f32.xlu0 %v299_v45  ;;  %v300_v47 = vmul.f32 %v750_v43, %v750_v43  ;;  %v515_v49 = vadd.f32 %v514_v46, %v513_v42  ;;  %v302_v50 = vmul.f32 %v752_v44, %v752_v44 }
 0x113   :  { %v516_v58 = vpop.f32.mrf.mxu1  ;;  %v799_v45 = vrot.slane %v741_v26, %v377_v35  ;;  %v432_v35 = vld [vmem:[#allocation7 + $0x28] sm:$0xff] }
 0x114   :  { %v763_v51 = vadd.f32 %v515_v49, %v103_v29 }
 0x115   :  { %v517_v59 = vpop.f32.mrf.mxu1 }
 0x116   :  { %307 = vadd.xlane.f32.xlu1 %v300_v47  ;;  %309 = vadd.xlane.f32.xlu0 %v301_v48  ;;  %v303_v52 = vmul.f32 %v763_v51, %v763_v51  ;;  %v518_v60 = vadd.f32 %v517_v59, %v516_v58 }
 0x118   :  { %v784_v61 = vadd.f32 %v518_v60, %v103_v29 }
 0x11a   :  { %311 = vadd.xlane.f32.xlu1 %v302_v50  ;;  %289 = vadd.xlane.f32.xlu0 %v750_v43  ;;  %v304_v62 = vmul.f32 %v784_v61, %v784_v61 }
 0x11e   :  { %295 = vadd.xlane.f32.xlu0 %v763_v51 }
 0x122   :  { %313 = vadd.xlane.f32.xlu0 %v303_v52 }
 0x12b   :  { %398 = vperm.xlu1 %545, %v386_v53  }
 0x12f   :  { %403 = vperm.xlu1 %545, %v387_v54   ;;  %v427_v54 = vld [vmem:[#allocation7] sm:$0xff] }
 0x133   :  { %408 = vperm.xlu1 %545, %v388_v55  }
 0x137   :  { %413 = vperm.xlu1 %545, %v389_v56  }
 0x138   :  { %393 = vperm.xlu0 %544, %v385_v57  }
 0x15b   :  { %297 = vadd.xlane.f32.xlu1 %v784_v61 }
 0x15f   :  { %315 = vadd.xlane.f32.xlu1 %v304_v62 }
 0x170   :  { %418 = vperm.xlu1 %545, %v390_v63  }
 0x197   :  { %v292_v0 = vpop.xlane.xlu1 %291  ;;  %v288_v1 = vpop.xlane.xlu0 %287 }
 0x198   :  { %v317_v2 = vmul.f32 0.03125, %v288_v1  ;;  %v319_v5 = vmul.f32 0.03125, %v292_v0  ;;  %v429_v0 = vld [vmem:[#allocation7 + $0x10] sm:$0xff] }
 0x19a   :  { %v329_v6 = vmul.f32 %v317_v2, %v317_v2  ;;  %v331_v11 = vmul.f32 %v319_v5, %v319_v5  ;;  %v341_v39 = vsub.f32 %v744_v36, %v317_v2  ;;  %v343_v49 = vsub.f32 %v746_v37, %v319_v5 }
 0x19b   :  { %v294_v3 = vpop.xlane.xlu1 %293  ;;  %v306_v4 = vpop.xlane.xlu0 %305 }
 0x19c   :  { %v323_v7 = vmul.f32 0.03125, %v306_v4  ;;  %v320_v12 = vmul.f32 0.03125, %v294_v3 }
 0x19e   :  { %v335_v8 = vsub.f32 %v323_v7, %v329_v6  ;;  %v332_v18 = vmul.f32 %v320_v12, %v320_v12  ;;  %v344_v55 = vsub.f32 %v752_v44, %v320_v12  ;;  %v430_v6 = vld [vmem:[#allocation7 + $0x18] sm:$0xff] }
 0x19f   :  { %v308_v9 = vpop.xlane.xlu1 %307  ;;  %v310_v10 = vpop.xlane.xlu0 %309 }
 0x1a0   :  { %v347_v13 = vadd.f32 1e-05, %v335_v8  ;;  %v325_v14 = vmul.f32 0.03125, %v310_v10  ;;  %v324_v22 = vmul.f32 0.03125, %v308_v9 }
 0x1a2   :  { %571 = vrsqrt.f32 %v347_v13  ;;  %v337_v15 = vsub.f32 %v325_v14, %v331_v11  ;;  %v428_v11 = vld [vmem:[#allocation7 + $0x8] sm:$0xff] }
 0x1a3   :  { %v312_v16 = vpop.xlane.xlu1 %311  ;;  %v290_v17 = vpop.xlane.xlu0 %289 }
 0x1a4   :  { %v349_v19 = vadd.f32 1e-05, %v337_v15  ;;  %v326_v20 = vmul.f32 0.03125, %v312_v16  ;;  %v318_v21 = vmul.f32 0.03125, %v290_v17 }
 0x1a6   :  { %573 = vrsqrt.f32 %v349_v19  ;;  %v338_v23 = vsub.f32 %v326_v20, %v332_v18  ;;  %v330_v25 = vmul.f32 %v318_v21, %v318_v21  ;;  %v342_v59 = vsub.f32 %v750_v43, %v318_v21  ;;  %v431_v18 = vld [vmem:[#allocation7 + $0x20] sm:$0xff] }
 0x1a7   :  { %v296_v27 = vpop.xlane.xlu0 %295  ;;  %v399_v48 = vpop.permute.xlu1 %398 }
 0x1a8   :  { %v350_v28 = vadd.f32 1e-05, %v338_v23  ;;  %v336_v29 = vsub.f32 %v324_v22, %v330_v25  ;;  %v321_v30 = vmul.f32 0.03125, %v296_v27 }
 0x1aa   :  { %575 = vrsqrt.f32 %v350_v28  ;;  %v348_v31 = vadd.f32 1e-05, %v336_v29  ;;  %v333_v33 = vmul.f32 %v321_v30, %v321_v30  ;;  %v345_v8 = vsub.f32 %v763_v51, %v321_v30 }
 0x1ab   :  { %v314_v34 = vpop.xlane.xlu0 %313  ;;  %v404_v58 = vpop.permute.xlu1 %403 }
 0x1ac   :  { %577 = vrsqrt.f32 %v348_v31  ;;  %v327_v38 = vmul.f32 0.03125, %v314_v34 }
 0x1ae   :  { %v339_v41 = vsub.f32 %v327_v38, %v333_v33 }
 0x1af   :  { %v572_v42 = vpop.eup %571  ;;  %v409_v7 = vpop.permute.xlu1 %408 }
 0x1b0   :  { %v351_v46 = vadd.f32 1e-05, %v339_v41  ;;  %v359_v47 = vmul.f32 %v572_v42, %v341_v39 }
 0x1b2   :  { %579 = vrsqrt.f32 %v351_v46  ;;  %v369_v50 = vmul.f32 %v796_v40, %v359_v47 }
 0x1b3   :  { %v574_v24 = vpop.eup %573  ;;  %v394_v52 = vpop.permute.xlu0 %393 }
 0x1b4   :  { %v361_v53 = vmul.f32 %v574_v24, %v343_v49  ;;  %v379_v36 = vadd.f32 %v799_v45, %v369_v50  ;;  %v414_v19 = vpop.permute.xlu1 %413 }
 0x1b6   :  { %v371_v56 = vmul.f32 %v796_v40, %v361_v53  ;;  %v421_v26 = vmul.f32 %v394_v52, %v379_v36 }
 0x1b7   :  { %v576_v57 = vpop.eup %575 }
 0x1b8   :  { %v381_v37 = vadd.f32 %v799_v45, %v371_v56  ;;  %v362_v60 = vmul.f32 %v576_v57, %v344_v55  ;;  %v433_v62 = vadd.f32 %v427_v54, %v421_v26 }
 0x1b9   :  { %v578_v63 = vpop.eup %577 }
 0x1ba   :  { %v360_v1 = vmul.f32 %v578_v63, %v342_v59  ;;  %v423_v2 = vmul.f32 %v404_v58, %v381_v37  ;;  %v372_v3 = vmul.f32 %v796_v40, %v362_v60  ;;  %439 = vst [vmem:[#allocation8] sm:$0xff] %v433_v62 }
 0x1bc   :  { %v370_v44 = vmul.f32 %v796_v40, %v360_v1  ;;  %v435_v4 = vadd.f32 %v429_v0, %v423_v2  ;;  %v382_v5 = vadd.f32 %v799_v45, %v372_v3 }
 0x1be   :  { %v380_v43 = vadd.f32 %v799_v45, %v370_v44  ;;  %441 = vst [vmem:[#allocation8 + $0x10] sm:$0xff] %v435_v4  ;;  %v424_v9 = vmul.f32 %v409_v7, %v382_v5 }
 0x1bf   :  { %v580_v10 = vpop.eup %579 }
 0x1c0   :  { %v422_v12 = vmul.f32 %v399_v48, %v380_v43  ;;  %v436_v13 = vadd.f32 %v430_v6, %v424_v9  ;;  %v363_v14 = vmul.f32 %v580_v10, %v345_v8 }
 0x1c2   :  { %v434_v15 = vadd.f32 %v428_v11, %v422_v12  ;;  %442 = vst [vmem:[#allocation8 + $0x18] sm:$0xff] %v436_v13  ;;  %v373_v16 = vmul.f32 %v796_v40, %v363_v14 }
 0x1c4   :  { %440 = vst [vmem:[#allocation8 + $0x8] sm:$0xff] %v434_v15  ;;  %v383_v17 = vadd.f32 %v799_v45, %v373_v16 }
 0x1c6   :  { %v425_v20 = vmul.f32 %v414_v19, %v383_v17 }
 0x1c8   :  { %v437_v21 = vadd.f32 %v431_v18, %v425_v20 }
 0x1ca   :  { %443 = vst [vmem:[#allocation8 + $0x20] sm:$0xff] %v437_v21 }
 0x1e4   :  { %v298_v51 = vpop.xlane.xlu1 %297 }
 0x1e5   :  { %v322_v22 = vmul.f32 0.03125, %v298_v51 }
 0x1e7   :  { %v334_v25 = vmul.f32 %v322_v22, %v322_v22  ;;  %v346_v30 = vsub.f32 %v784_v61, %v322_v22 }
 0x1e8   :  { %v316_v23 = vpop.xlane.xlu1 %315 }
 0x1e9   :  { %v328_v27 = vmul.f32 0.03125, %v316_v23 }
 0x1eb   :  { %v340_v28 = vsub.f32 %v328_v27, %v334_v25 }
 0x1ec   :  { %v419_v38 = vpop.permute.xlu1 %418 }
 0x1ed   :  { %v352_v29 = vadd.f32 1e-05, %v340_v28 }
 0x1ef   :  { %581 = vrsqrt.f32 %v352_v29 }
 0x1fc   :  { %v582_v31 = vpop.eup %581 }
 0x1fd   :  { %v364_v32 = vmul.f32 %v582_v31, %v346_v30 }
 0x1ff   :  { %v374_v33 = vmul.f32 %v796_v40, %v364_v32 }
 0x201   :  { %v384_v34 = vadd.f32 %v799_v45, %v374_v33 }
 0x203   :  { %v426_v39 = vmul.f32 %v419_v38, %v384_v34 }
 0x205   :  { %v438_v41 = vadd.f32 %v432_v35, %v426_v39 }
 0x207   :  { %444 = vst [vmem:[#allocation8 + $0x28] sm:$0xff] %v438_v41 }
 0x208   :  { %654 = shalt.err (!%p651_p5)
}
 0x209   :  { %456 = dma.vmem_to_hbm [thread:$0]  %s451_s7, 768, %s829_s5, [#allocation4], %s674_s2, %s674_s2, %s675_s8  }
 0x20a   :  { %667 = dma.done.wait [#allocation4], 768  }
 0x20b   :  { %668 = vsyncadd [#allocation4], 4294966528 }
 0x20c   :  { %460 = vsyncpa [#allocation3], 1 }
 0x20d   :  { %461 = vsyncpa [#allocation6], 1 }
 0x20e   :  { %462 = vsyncpa [#allocation4], 1 }

</bundles_post_ra>
